<compile_context>
chip_gen: v5e
topology: v5e:2x2
jax: 0.10.0
libtpu: 0.0.40
codegen_flags: <defaults>
</compile_context>

<pallas_src>
import jax
import jax.numpy as jnp
from jax.experimental import pallas as pl
from jax.experimental.pallas import tpu as pltpu


def _qact_kernel(scale_ref, x_ref, o_ref):
    """Quantize one (br, bw) tile: (x / scale).clamp(-128, 127) -> int8.

    scale_ref: SMEM f32[1]   (scalar-prefetch operand; no recompile per scale)
    x_ref:     VMEM float[br, bw]
    o_ref:     VMEM int8 [br, bw]
    """
    s = scale_ref[0]
    x = x_ref[...].astype(jnp.float32)   # no-op for f32; also accepts bf16 inputs
    y = x / s                            # true divide: bit-exact vs PyTorch; EUP work hidden under DMA
    y = jnp.clip(y, -128.0, 127.0)       # clamp to int8 range
    o_ref[...] = y.astype(jnp.int8)      # f32->int8 truncates toward zero (matches torch .to(int8))


def _pick_slab(shape, n):
    """Choose a (rows, w) 2-D view of the row-major flatten with NO pad/slice copies."""
    ndim = len(shape)
    last = shape[-1] if ndim else 1
    if ndim >= 2 and last % 128 == 0 and last <= 8192:
        return n // last, last           # collapse leading dims: cheap reshape, lane-dense
    if ndim <= 1 and n % 128 == 0 and n <= 8192:
        return 1, n
    for w in (2048, 1024, 512, 256, 128):
        if n % w == 0:
            return n // w, w             # generic lane-dense slab (w divides n exactly)
    # Ragged fallback: keep the natural trailing dim on the lane axis.
    if ndim >= 2:
        return n // last, last
    return 1, n


def _pick_blocks(rows, w):
    """Adaptive tile: ~2 MiB f32 input, >= ~8 row blocks when possible, rows % 32 == 0."""
    bw = w if w <= 8192 else 2048                      # lane block: full dim, or a 128-multiple
    br = max(1, (2 * 1024 * 1024) // (4 * bw))         # ~2 MiB f32 per input tile
    br = min(br, max(1, pl.cdiv(rows, 8)))             # keep >= ~8 row steps (v7x 2-TC split + pipelining)
    if br < rows:
        br = max(32, (br // 32) * 32)                  # multiple of 32: unmasked packed int8 stores
        br = min(br, rows)
    else:
        br = rows                                      # single full-dim block (always legal)
    return br, bw


def qact(x, scale):
    """(x / scale).clamp(-128, 127).astype(int8) for any rank / float dtype."""
    orig_shape = x.shape
    n = x.size
    rows, w = _pick_slab(orig_shape, n)
    x2 = x.reshape(rows, w)              # pure layout plumbing; no pad, no slice

    br, bw = _pick_blocks(rows, w)
    grid = (pl.cdiv(rows, br), pl.cdiv(w, bw))

    scale_arr = jnp.asarray(scale, dtype=jnp.float32).reshape(1)

    out2 = pl.pallas_call(
        _qact_kernel,
        out_shape=jax.ShapeDtypeStruct((rows, w), jnp.int8),
        grid_spec=pltpu.PrefetchScalarGridSpec(
            num_scalar_prefetch=1,       # scale -> SMEM, passed to kernel & index_maps
            grid=grid,
            in_specs=[pl.BlockSpec((br, bw), lambda i, j, s: (i, j))],
            out_specs=pl.BlockSpec((br, bw), lambda i, j, s: (i, j)),
        ),
        compiler_params=pltpu.CompilerParams(
            # TODO(synk): verify "parallel" actually shards row blocks across
            # v7x's two TensorCores; if not, switch the row axis to
            # pltpu.CORE_PARALLEL.
            dimension_semantics=("parallel", "parallel"),
        ),
    )(scale_arr, x2)

    return out2.reshape(orig_shape)


def qact_ref(x, scale):
    """Pure-JAX reference mirroring the PyTorch forward (true divide)."""
    return jnp.clip(x.astype(jnp.float32) / scale, -128.0, 127.0).astype(jnp.int8)


if __name__ == "__main__":
    key = jax.random.PRNGKey(0)
    scale = 0.05  # module stores this python scalar at __init__

    qact_jit = jax.jit(qact)

    # Main case: small activation tensor with a lane-aligned hidden dim.
    B, L, D = 2, 8, 128
    x = jax.random.normal(key, (B, L, D), dtype=jnp.float32) * 10.0
    out = jax.block_until_ready(qact_jit(x, scale))
    ref = qact_ref(x, scale)
    assert out.dtype == jnp.int8 and out.shape == x.shape
    diff = jnp.abs(out.astype(jnp.int32) - ref.astype(jnp.int32))
    # True divide in-kernel should match the reference exactly; allow 1 LSB of
    # slack only for pathological rounding at truncation/clamp boundaries.
    assert int(jnp.max(diff)) <= 1, "Pallas QAct mismatch vs reference"
    assert float(jnp.mean((diff == 0).astype(jnp.float32))) > 0.99, \
        "Pallas QAct: too many boundary mismatches vs reference"

    # Ragged case: exercises the no-pad fallback path (block spans full dims).
    x2 = jax.random.normal(jax.random.PRNGKey(1), (3, 5, 7), dtype=jnp.float32) * 10.0
    out2 = jax.block_until_ready(qact_jit(x2, scale))
    ref2 = qact_ref(x2, scale)
    assert out2.dtype == jnp.int8 and out2.shape == x2.shape
    diff2 = jnp.abs(out2.astype(jnp.int32) - ref2.astype(jnp.int32))
    assert int(jnp.max(diff2)) <= 1, "Pallas QAct (ragged) mismatch vs reference"

    print("KERNEL_OK")
</pallas_src>

<mosaic_0001>
module attributes {stable_mosaic.version = 11 : i64} {
  func.func @_qact_kernel(%arg0: i32, %arg1: i32, %arg2: memref<1xf32, #tpu.memory_space<smem>>, %arg3: memref<16x128xf32, #tpu.memory_space<vmem>>, %arg4: memref<16x128xi8, #tpu.memory_space<vmem>>) attributes {dimension_semantics = [#tpu.dimension_semantics<parallel>, #tpu.dimension_semantics<parallel>], iteration_bounds = array<i64: 1, 1>, scalar_prefetch = 1 : i64, scratch_operands = 0 : i64, tpu.core_type = #tpu.core_type<tc>, window_params = [{transform_indices = @transform_0, window_bounds = array<i64: 16, 128>}, {transform_indices = @transform_1, window_bounds = array<i64: 16, 128>}]} {
    %c0 = arith.constant 0 : index
    %0 = memref.load %arg2[%c0] : memref<1xf32, #tpu.memory_space<smem>>
    %c0_0 = arith.constant 0 : index
    %c0_1 = arith.constant 0 : index
    %1 = vector.load %arg3[%c0_0, %c0_1] : memref<16x128xf32, #tpu.memory_space<vmem>>, vector<16x128xf32>
    %2 = vector.broadcast %0 : f32 to vector<16x128xf32>
    %3 = arith.divf %1, %2 : vector<16x128xf32>
    %cst = arith.constant -1.280000e+02 : f32
    %cst_2 = arith.constant 1.270000e+02 : f32
    %4 = vector.broadcast %cst : f32 to vector<16x128xf32>
    %5 = arith.maximumf %4, %3 : vector<16x128xf32>
    %6 = vector.broadcast %cst_2 : f32 to vector<16x128xf32>
    %7 = arith.minimumf %6, %5 : vector<16x128xf32>
    %8 = arith.fptosi %7 : vector<16x128xf32> to vector<16x128xi8>
    %c0_3 = arith.constant 0 : index
    %c0_4 = arith.constant 0 : index
    %9 = vector.load %arg4[%c0_3, %c0_4] : memref<16x128xi8, #tpu.memory_space<vmem>>, vector<16x128xi8>
    tpu.vector_store %arg4[%c0_3, %c0_4], %8 {strides = array<i32>} : memref<16x128xi8, #tpu.memory_space<vmem>>, vector<16x128xi8>,
    return
  }
  func.func @transform_0(%arg0: i32, %arg1: i32, %arg2: memref<1xf32, #tpu.memory_space<smem>>) -> (i32, i32) {
    %c0_i32 = arith.constant 0 : i32
    return %arg0, %arg1 : i32, i32
  }
  func.func @transform_1(%arg0: i32, %arg1: i32, %arg2: memref<1xf32, #tpu.memory_space<smem>>) -> (i32, i32) {
    %c0_i32 = arith.constant 0 : i32
    return %arg0, %arg1 : i32, i32
  }
}

</mosaic_0001>

<bundles_post_ra>
// kernel: qact.1
= control target key start
LH: loop header
LB: loop body
LE: loop exit
PB: predicated region body
PF: predicated region fallthrough
CT: control target
= control target key end

     0   :  { %8 = vsyncpa [#allocation5], 0  ;;  %s186_s0 = inlined_call_operand.<no memory space> [shape: f32[1], index: 0, kind: input, shape index: {}]   ;;  %s187_s1 = inlined_call_operand.hbm [shape: f32[16,128], index: 1, kind: input, shape index: {}]   ;;  %s188_s2 = inlined_call_operand.hbm [shape: s8[16,128], index: 2, kind: output, shape index: {}]  }
   0x1   :  { %9 = vsyncpa [#allocation6], 0  ;;  %s14_s11 = sshll.u32 %s187_s1, 4  ;;  %s156_s12 = smov [#allocation4]   ;;  %s15_s11 = int_to_ptr.hbm [resolvable:$true] %s14_s11 }
   0x2   :  { %s16_s13 = sshll.u32 %s156_s12, 4  ;;  %s157_s14 = smov 128   ;;  %s17_s13 = int_to_ptr.vmem [resolvable:$true] %s16_s13 }
   0x3   :  { %s158_s15 = smov 8  }
   0x4   :  { %22 = dma.hbm_to_vmem [thread:$0]  %s15_s11, 256, %s17_s13, [#allocation5], %s157_s14, %s157_s14, %s158_s15  }
   0x5   :  { %152 = dma.done.wait [#allocation5], 256  }
   0x6   :  { %153 = vsyncadd [#allocation5], 4294967040  ;;  %v30_v0 = vstv %s186_s0  ;;  %v28_v9 = vld [vmem:[#allocation4] sm:$0xff]  ;;  %v29_v10 = vld [vmem:[#allocation4 + $0x8] sm:$0xff]  ;;  %s159_s0 = smov [#allocation7]   ;;  %s69_s20 = sshll.u32 %s188_s2, 4  ;;  %s70_s20 = int_to_ptr.hbm [resolvable:$true] %s69_s20 }
   0x7   :  { %102 = vrcp.f32 %v30_v0  ;;  %v42_v3 = vand.u32 2147483648, %v30_v0  ;;  %vm36_vm0 = vweird.f32 %v30_v0  ;;  %v40_v5 = vand.u32 2147483647, %v30_v0  ;;  %s67_s1 = sshll.u32 %s159_s0, 4  ;;  %s160_s21 = smov 32   ;;  %s68_s1 = int_to_ptr.vmem [resolvable:$true] %s67_s1 }
   0x8   :  { %s161_s22 = smov 2  }
   0x9   :  { %v43_v7 = vor.u32 1.1754944e-38, %v42_v3  ;;  %vm41_vm3 = vcmp.eq.f32.partialorder %v40_v5, 8.507059e+37 }
   0xd   :  { %v103_v1 = vpop.eup %102 }
   0xe   :  { %v32_v2 = vmul.f32 %v103_v1, %v30_v0  ;;  %vm37_vm1 = vweird.f32 %v103_v1 }
   0xf   :  { %vm38_vm2 = vmor %vm36_vm0, %vm37_vm1 }
  0x10   :  { %v33_v4 = vsub.f32 1.0, %v32_v2 }
  0x12   :  { %v34_v6 = vmul.f32 %v103_v1, %v33_v4 }
  0x14   :  { %v35_v8 = vadd.f32 %v103_v1, %v34_v6 }
  0x16   :  { %v39_v11 = vsel %vm38_vm2, %v103_v1, %v35_v8 }
  0x17   :  { %v44_v12 = vsel %vm41_vm3, %v43_v7, %v39_v11 }
  0x18   :  { %v45_v13 = vmul.f32 %v44_v12, %v28_v9  ;;  %v46_v14 = vmul.f32 %v44_v12, %v29_v10 }
  0x1a   :  { %v82_v15 = vmax.f32 %v45_v13, -128.0  ;;  %v84_v16 = vmax.f32 %v46_v14, -128.0 }
  0x1c   :  { %v83_v17 = vmin.f32 %v82_v15, 127.0  ;;  %v85_v18 = vmin.f32 %v84_v16, 127.0 }
  0x1e   :  { %vm86_vm4 = vcmp.lt.s32.totalorder %v83_v17, 0  ;;  %v87_v19 = vceil.f32 %v83_v17  ;;  %v88_v20 = vfloor.f32 %v83_v17  ;;  %vm91_vm5 = vcmp.lt.s32.totalorder %v85_v18, 0 }
  0x1f   :  { %v92_v21 = vceil.f32 %v85_v18  ;;  %v93_v22 = vfloor.f32 %v85_v18 }
  0x20   :  { %v89_v23 = vsel %vm86_vm4, %v87_v19, %v88_v20 }
  0x21   :  { %v90_v24 = vcvt.f32.s32 %v89_v23  ;;  %v94_v25 = vsel %vm91_vm5, %v92_v21, %v93_v22 }
  0x22   :  { %v95_v26 = vcvt.f32.s32 %v94_v25 }
  0x23   :  { %v57_v27 = vpack.c.b16 %v90_v24, %v90_v24 }
  0x24   :  { %v59_v28 = vpack.c.b16 %v95_v26, %v95_v26 }
  0x25   :  { %v58_v29 = vpack.c.b8 %v57_v27, %v57_v27 }
  0x26   :  { %v60_v30 = vpack.c.b8 %v59_v28, %v59_v28 }
  0x27   :  { %61 = vst [vmem:[#allocation7] sm:$0x3] %v58_v29 }
  0x28   :  { %62 = vst [vmem:[#allocation7 + $0x2] sm:$0x3] %v60_v30 }
  0x29   :  { %75 = dma.vmem_to_hbm [thread:$0]  %s68_s1, 64, %s70_s20, [#allocation6], %s160_s21, %s160_s21, %s161_s22  }
  0x2a   :  { %154 = dma.done.wait [#allocation6], 64  }
  0x2b   :  { %155 = vsyncadd [#allocation6], 4294967232 }
  0x2c   :  { %80 = vsyncpa [#allocation5], 1 }
  0x2d   :  { %81 = vsyncpa [#allocation6], 1 }

</bundles_post_ra>
